<compile_context>
chip_gen: v6e
topology: v6e:2x2x1
jax: 0.10.0
libtpu: 0.0.40
codegen_flags: <defaults>
</compile_context>

<pallas_src>
import numpy as np

import jax
import jax.numpy as jnp
from jax.experimental import pallas as pl
from jax.experimental.pallas import tpu as pltpu


_VMEM = pl.BlockSpec(memory_space=pltpu.MemorySpace.VMEM)


def _shift_lanes(x, shift):
    """y[:, q] = x[:, q + shift] (lane rotation; wrapped lanes never feed valid outputs)."""
    if shift == 0:
        return x
    lanes = x.shape[-1]
    return pltpu.roll(x, shift=lanes - shift, axis=1)


def _conv_stack_meta(batch, img_h, img_w, in_channels, conv_out_channels, kernel_sizes):
    """Static metadata for the conv/pool stack on the per-sample H*W lane grid.

    Rows are (b, c) = b*C + c; lanes are h*W + w.  After each conv/pool, valid
    data lives on a stride-2^k lane sub-grid of each sample's own row block.
    """
    meta = []
    stride, h, w, c_in = 1, img_h, img_w, in_channels
    for c_out, k in zip(conv_out_channels, kernel_sizes):
        assert h >= k and w >= k, "conv kernel larger than remaining spatial extent"
        # Roll-wrap safety: every lane read for a valid output is a genuine
        # in-image position (< img_h*img_w), so pltpu.roll's wrapped tail can
        # never alias a valid output lane.
        assert stride * (h - 1) <= img_h - 1 and stride * (w - 1) <= img_w - 1
        tap_shifts = tuple(stride * (i * img_w + j) for i in range(k) for j in range(k))
        h, w = h - k + 1, w - k + 1                 # 'valid' convolution
        assert h >= 2 and w >= 2, "2x2 max pool needs at least a 2x2 grid"
        pool_shifts = (stride, stride * img_w)      # 2x2 max pool (floor mode)
        h, w = h // 2, w // 2
        rpad = ((batch * c_in + 7) // 8) * 8        # 8-aligned per-tap row block
        meta.append(dict(c_in=c_in, c_out=c_out, k=k, rpad=rpad,
                         tap_shifts=tap_shifts, pool_shifts=pool_shifts))
        c_in, stride = c_out, stride * 2
    return meta, c_in, h, w, stride


def make_cats_dogs_forward(batch, img_h, img_w, in_channels, conv_out_channels,
                           kernel_sizes, linear_out_features, n_targets):
    """Returns (forward_fn, fold_params_fn) for the fully fused Pallas kernel."""
    meta, c_last, h_f, w_f, stride_f = _conv_stack_meta(
        batch, img_h, img_w, in_channels, conv_out_channels, kernel_sizes)
    assert len(linear_out_features) >= 1, "first dense layer absorbs the flatten"
    n_spatial = h_f * w_f                      # pooled spatial positions per sample
    n_lin = len(linear_out_features)
    n1 = linear_out_features[0]
    L = img_h * img_w                          # per-sample lane axis (H*W)
    n_stack_max = max(len(b["tap_shifts"]) * b["rpad"] for b in meta)

    # ------------------------------ kernel ---------------------------------
    def kernel(*refs):
        it = iter(refs)
        x_ref = next(it)                                   # (B*C_in, L) f32
        conv_refs = [(next(it), next(it)) for _ in meta]   # (B*Co, k*k*rpad) bf16, (B*Co,1) f32
        wbig_ref = next(it)                                # (L, c_last*N1) bf16
        mask_ref = next(it)                                # (B*c_last, c_last*N1) f32
        gsum_ref = next(it)                                # (c_last*N1, N1) f32 (0/1)
        bsum_ref = next(it)                                # (B, B*c_last) f32 (0/1)
        b1_ref = next(it)                                  # (1, N1) f32
        lin_refs = [(next(it), next(it)) for _ in range(n_lin - 1)]
        wf_ref = next(it)                                  # (N_last, n_targets) bf16
        bf_ref = next(it)                                  # (1, n_targets) f32
        out_ref = next(it)                                 # (B, n_targets) f32
        stack_ref = next(it)                               # (n_stack_max, L) f32 scratch

        # Zero the tap-stack scratch once so the 8-alignment padding rows are
        # exact zeros for every conv layer (their weight columns are zero too).
        stack_ref[...] = jnp.zeros_like(stack_ref)

        x = x_ref[...]                                     # (B*C, L) f32, lane-dense
        for blk, (w_ref, b_ref) in zip(meta, conv_refs):
            rpad, taps = blk["rpad"], blk["tap_shifts"]
            rows = x.shape[0]                              # batch * c_in of this layer
            nstack = len(taps) * rpad
            # Stack the k*k lane-shifted activation copies (8-row-aligned blocks).
            for t, sh in enumerate(taps):
                stack_ref[pl.ds(t * rpad, rows), :] = _shift_lanes(x, sh)
            stacked = stack_ref[pl.ds(0, nstack), :].astype(jnp.bfloat16)
            # Conv + folded BN = ONE matmul against a block-diagonal (per-batch)
            # bf16 weight; f32 accumulate; bias; ReLU.
            y = jnp.dot(w_ref[...], stacked, preferred_element_type=jnp.float32)
            y = jnp.maximum(y + b_ref[...], 0.0)
            # Fused 2x2 max pool: two shift-and-max passes (f32 on all gens).
            dw, dh = blk["pool_shifts"]
            y = jnp.maximum(y, _shift_lanes(y, dw))
            x = jnp.maximum(y, _shift_lanes(y, dh))

        # Flatten (NCHW order) + first linear, merged:
        #   R[b*c_last+c', c*N1+n] = sum_s x[b*c_last+c', lane(s)] * W1[n, c*n_spatial+s]
        # (garbage lanes of x hit all-zero rows of wbig -> exact-zero contribution;
        #  x is finite by construction, so 0*x is exactly 0).
        R = jnp.dot(x.astype(jnp.bfloat16), wbig_ref[...],
                    preferred_element_type=jnp.float32)    # (B*c_last, c_last*N1)
        Rm = R * mask_ref[...]                             # keep only c' == c
        Y = jnp.dot(Rm, gsum_ref[...],
                    preferred_element_type=jnp.float32)    # (B*c_last, N1)
        z = jnp.dot(bsum_ref[...], Y,
                    preferred_element_type=jnp.float32)    # (B, N1): sum over channels
        z = jnp.maximum(z + b1_ref[...], 0.0)

        for wl_ref, bl_ref in lin_refs:                    # extra linear blocks
            z = jnp.maximum(
                jnp.dot(z.astype(jnp.bfloat16), wl_ref[...],
                        preferred_element_type=jnp.float32) + bl_ref[...], 0.0)

        logits = (jnp.dot(z.astype(jnp.bfloat16), wf_ref[...],
                          preferred_element_type=jnp.float32)
                  + bf_ref[...])                           # (B, n_targets)
        out_ref[...] = jax.nn.sigmoid(logits)

    n_inputs = 1 + 2 * len(meta) + 5 + 2 * (n_lin - 1) + 2

    # Advisory cost estimate (includes weights / constants this time).
    flops = 0
    bytes_accessed = 4 * batch * in_channels * L + 4 * batch * n_targets
    for blk in meta:
        m_, k_ = batch * blk["c_out"], len(blk["tap_shifts"]) * blk["rpad"]
        flops += 2 * m_ * k_ * L
        bytes_accessed += 2 * m_ * k_ + 4 * m_
    flops += 2 * (batch * c_last) * L * (c_last * n1)              # expand matmul
    flops += 2 * (batch * c_last) * (c_last * n1) * n1             # gsum contraction
    flops += 2 * batch * (batch * c_last) * n1                     # bsum contraction
    bytes_accessed += (2 * L * c_last * n1 + 4 * batch * c_last * c_last * n1
                       + 4 * c_last * n1 * n1 + 4 * batch * batch * c_last + 4 * n1)
    dims = list(linear_out_features) + [n_targets]
    for d_in, d_out in zip(dims[:-1], dims[1:]):
        flops += 2 * batch * d_in * d_out
        bytes_accessed += 2 * d_in * d_out + 4 * d_out

    fused = pl.pallas_call(
        kernel,
        out_shape=jax.ShapeDtypeStruct((batch, n_targets), jnp.float32),
        in_specs=[_VMEM] * n_inputs,
        out_specs=_VMEM,
        scratch_shapes=[pltpu.VMEM((n_stack_max, L), jnp.float32)],
        cost_estimate=pl.CostEstimate(
            flops=flops,
            transcendentals=batch * n_targets,
            bytes_accessed=bytes_accessed),
    )

    # ------------------------ one-time parameter prep ------------------------
    def fold_params(params, eps=1e-5):
        """Fold BN into conv weights, batch-interleave into block-diagonal weights,
        NCHW flatten into the first linear layer, and cast matmul weights to bf16."""
        ops = []
        for blk, cp in zip(meta, params["conv_blocks"]):
            scale = np.asarray(cp["gamma"]) / np.sqrt(np.asarray(cp["var"]) + eps)
            bias = np.asarray(cp["beta"]) - np.asarray(cp["mean"]) * scale
            wf = np.asarray(cp["w"]) * scale[:, None, None, None]     # (Co,Ci,k,k)
            k, ci, co, rpad = blk["k"], blk["c_in"], blk["c_out"], blk["rpad"]
            wk = np.zeros((batch * co, k * k * rpad), np.float32)
            taps_ij = [(i, j) for i in range(k) for j in range(k)]
            for t, (i, j) in enumerate(taps_ij):
                for b in range(batch):
                    wk[b * co:(b + 1) * co,
                       t * rpad + b * ci: t * rpad + b * ci + ci] = wf[:, :, i, j]
            bias_k = np.tile(bias.astype(np.float32), batch).reshape(batch * co, 1)
            ops += [jnp.asarray(wk, jnp.bfloat16), jnp.asarray(bias_k, jnp.float32)]

        # Flatten + linear-1 constants.
        lp0 = params["linear_blocks"][0]
        w1 = np.asarray(lp0["w"], np.float32)                # (N1, c_last*n_spatial)
        assert w1.shape == (n1, c_last * n_spatial), w1.shape
        wbig = np.zeros((L, c_last * n1), np.float32)
        for c in range(c_last):
            for p in range(h_f):
                for q in range(w_f):
                    s = p * w_f + q
                    lane = stride_f * (p * img_w + q)        # pooled lane of (p,q)
                    wbig[lane, c * n1:(c + 1) * n1] = w1[:, c * n_spatial + s]
        mask = np.zeros((batch * c_last, c_last * n1), np.float32)
        gsum = np.zeros((c_last * n1, n1), np.float32)
        bsum = np.zeros((batch, batch * c_last), np.float32)
        for c in range(c_last):
            gsum[c * n1:(c + 1) * n1, :] = np.eye(n1, dtype=np.float32)
            for b in range(batch):
                mask[b * c_last + c, c * n1:(c + 1) * n1] = 1.0
        for b in range(batch):
            bsum[b, b * c_last:(b + 1) * c_last] = 1.0
        ops += [jnp.asarray(wbig, jnp.bfloat16), jnp.asarray(mask),
                jnp.asarray(gsum), jnp.asarray(bsum),
                jnp.asarray(np.asarray(lp0["b"], np.float32).reshape(1, n1))]

        for lp in params["linear_blocks"][1:]:
            ops += [jnp.asarray(np.asarray(lp["w"]).T, jnp.bfloat16),
                    jnp.asarray(np.asarray(lp["b"], np.float32).reshape(1, -1))]
        fp = params["final"]
        ops += [jnp.asarray(np.asarray(fp["w"]).T, jnp.bfloat16),
                jnp.asarray(np.asarray(fp["b"], np.float32).reshape(1, n_targets))]
        return ops

    # ------------------------------ forward ---------------------------------
    def forward(image_nchw, folded):
        # Free NCHW flatten view (no transpose, no extra XLA kernel): rows are
        # (b, c), lanes are (h, w).
        x2d = image_nchw.astype(jnp.float32).reshape(batch * in_channels, L)
        out = fused(x2d, *folded)                      # (B, n_targets)
        return out[:, 0] if n_targets == 1 else out    # == torch .squeeze(1)

    return forward, fold_params


# -------------------- pure-JAX reference (for validation) --------------------

def reference_forward(image_nchw, params, eps=1e-5):
    x = image_nchw.astype(jnp.float32)
    for cp in params["conv_blocks"]:
        x = jax.lax.conv_general_dilated(
            x, cp["w"], window_strides=(1, 1), padding="VALID",
            dimension_numbers=("NCHW", "OIHW", "NCHW"))
        scale = cp["gamma"] / jnp.sqrt(cp["var"] + eps)
        bias = cp["beta"] - cp["mean"] * scale
        x = x * scale[None, :, None, None] + bias[None, :, None, None]
        x = jnp.maximum(x, 0.0)
        x = jax.lax.reduce_window(x, -jnp.inf, jax.lax.max,
                                  (1, 1, 2, 2), (1, 1, 2, 2), "VALID")
    x = x.reshape(x.shape[0], -1)                      # PyTorch NCHW flatten
    for lp in params["linear_blocks"]:
        x = jnp.maximum(x @ lp["w"].T + lp["b"], 0.0)
    fp = params["final"]
    x = jax.nn.sigmoid(x @ fp["w"].T + fp["b"])
    return x[:, 0]


# ------------------------- deterministic parameters --------------------------

def init_params(key, in_channels, conv_out_channels, kernel_sizes,
                linear_out_features, n_targets, img_hw):
    keys = iter(jax.random.split(key, 64))
    params = {"conv_blocks": [], "linear_blocks": []}

    h = w = img_hw
    c_in = in_channels
    for c_out, k in zip(conv_out_channels, kernel_sizes):
        fan = c_in * k * k + c_out * k * k
        std = (2.0 / fan) ** 0.5
        params["conv_blocks"].append({
            "w": std * jax.random.normal(next(keys), (c_out, c_in, k, k), jnp.float32),
            "gamma": 1.0 + 0.1 * jax.random.normal(next(keys), (c_out,), jnp.float32),
            "beta": 0.1 * jax.random.normal(next(keys), (c_out,), jnp.float32),
            "mean": 0.1 * jax.random.normal(next(keys), (c_out,), jnp.float32),
            "var": 1.0 + 0.1 * jnp.abs(jax.random.normal(next(keys), (c_out,), jnp.float32)),
        })
        h, w = (h - k + 1) // 2, (w - k + 1) // 2
        c_in = c_out

    in_features = c_in * h * w
    for out_features in linear_out_features:
        std = (2.0 / (in_features + out_features)) ** 0.5
        params["linear_blocks"].append({
            "w": std * jax.random.normal(next(keys), (out_features, in_features), jnp.float32),
            "b": 0.1 * jax.random.normal(next(keys), (out_features,), jnp.float32),
        })
        in_features = out_features

    std = (2.0 / (in_features + n_targets)) ** 0.5
    params["final"] = {
        "w": std * jax.random.normal(next(keys), (n_targets, in_features), jnp.float32),
        "b": 0.1 * jax.random.normal(next(keys), (n_targets,), jnp.float32),
    }
    return params


# ----------------------------------- main ------------------------------------

if __name__ == "__main__":
    B, C_IN, IMG = 2, 3, 16
    CONV_OUT = [4, 8]
    KSIZES = [3, 3]
    LINEAR_OUT = [32]
    N_TARGETS = 1

    key = jax.random.PRNGKey(0)
    k_img, k_params = jax.random.split(key)

    image = jax.random.normal(k_img, (B, C_IN, IMG, IMG), jnp.float32)  # NCHW
    params = init_params(k_params, C_IN, CONV_OUT, KSIZES, LINEAR_OUT,
                         N_TARGETS, IMG)

    forward, fold_params = make_cats_dogs_forward(
        B, IMG, IMG, C_IN, CONV_OUT, KSIZES, LINEAR_OUT, N_TARGETS)

    folded = fold_params(params)        # one-time parameter prep (not hot path)

    out = jax.jit(forward)(image, folded)
    out = jax.block_until_ready(out)

    assert out.shape == (B,), out.shape
    assert bool(jnp.all(jnp.isfinite(out))) and bool(jnp.all((out >= 0) & (out <= 1)))

    # Validate against a plain-f32 JAX reference of the module.  Tolerance is
    # loosened vs. the previous f32-only kernel because matmul operands now run
    # in bf16 (f32 accumulation); elementwise math is still f32.
    ref = reference_forward(image, params)
    np.testing.assert_allclose(np.asarray(out), np.asarray(ref),
                               rtol=5e-2, atol=2e-2)

    print("KERNEL_OK")
</pallas_src>

<mosaic_0001>
module attributes {stable_mosaic.version = 11 : i64} {
  func.func @kernel(%arg0: memref<6x256xf32, #tpu.memory_space<vmem>>, %arg1: memref<8x72xbf16, #tpu.memory_space<vmem>>, %arg2: memref<8x1xf32, #tpu.memory_space<vmem>>, %arg3: memref<16x72xbf16, #tpu.memory_space<vmem>>, %arg4: memref<16x1xf32, #tpu.memory_space<vmem>>, %arg5: memref<256x256xbf16, #tpu.memory_space<vmem>>, %arg6: memref<16x256xf32, #tpu.memory_space<vmem>>, %arg7: memref<256x32xf32, #tpu.memory_space<vmem>>, %arg8: memref<2x16xf32, #tpu.memory_space<vmem>>, %arg9: memref<1x32xf32, #tpu.memory_space<vmem>>, %arg10: memref<32x1xbf16, #tpu.memory_space<vmem>>, %arg11: memref<1x1xf32, #tpu.memory_space<vmem>>, %arg12: memref<2x1xf32, #tpu.memory_space<vmem>>, %arg13: memref<72x256xf32, #tpu.memory_space<vmem>>) attributes {dimension_semantics = [], scalar_prefetch = 0 : i64, scratch_operands = 1 : i64, tpu.core_type = #tpu.core_type<tc>} {
    %cst = arith.constant 0.000000e+00 : f32
    %0 = vector.broadcast %cst : f32 to vector<72x256xf32>
    %c0 = arith.constant 0 : index
    %c0_0 = arith.constant 0 : index
    %1 = vector.load %arg13[%c0, %c0_0] : memref<72x256xf32, #tpu.memory_space<vmem>>, vector<72x256xf32>
    tpu.vector_store %arg13[%c0, %c0_0], %0 {strides = array<i32>} : memref<72x256xf32, #tpu.memory_space<vmem>>, vector<72x256xf32>,
    %c0_1 = arith.constant 0 : index
    %c0_2 = arith.constant 0 : index
    %2 = vector.load %arg0[%c0_1, %c0_2] : memref<6x256xf32, #tpu.memory_space<vmem>>, vector<6x256xf32>
    %c0_3 = arith.constant 0 : index
    %c0_4 = arith.constant 0 : index
    %3 = vector.load %arg13[%c0_3, %c0_4] : memref<72x256xf32, #tpu.memory_space<vmem>>, vector<6x256xf32>
    tpu.vector_store %arg13[%c0_3, %c0_4], %2 {strides = array<i32>} : memref<72x256xf32, #tpu.memory_space<vmem>>, vector<6x256xf32>,
    %c255_i32 = arith.constant 255 : i32
    %4 = tpu.dynamic_rotate %2 by %c255_i32 dim 1 : vector<6x256xf32>, i32 -> vector<6x256xf32>
    %c8 = arith.constant 8 : index
    %c0_5 = arith.constant 0 : index
    %5 = vector.load %arg13[%c8, %c0_5] : memref<72x256xf32, #tpu.memory_space<vmem>>, vector<6x256xf32>
    tpu.vector_store %arg13[%c8, %c0_5], %4 {strides = array<i32>} : memref<72x256xf32, #tpu.memory_space<vmem>>, vector<6x256xf32>,
    %c254_i32 = arith.constant 254 : i32
    %6 = tpu.dynamic_rotate %2 by %c254_i32 dim 1 : vector<6x256xf32>, i32 -> vector<6x256xf32>
    %c16 = arith.constant 16 : index
    %c0_6 = arith.constant 0 : index
    %7 = vector.load %arg13[%c16, %c0_6] : memref<72x256xf32, #tpu.memory_space<vmem>>, vector<6x256xf32>
    tpu.vector_store %arg13[%c16, %c0_6], %6 {strides = array<i32>} : memref<72x256xf32, #tpu.memory_space<vmem>>, vector<6x256xf32>,
    %c240_i32 = arith.constant 240 : i32
    %8 = tpu.dynamic_rotate %2 by %c240_i32 dim 1 : vector<6x256xf32>, i32 -> vector<6x256xf32>
    %c24 = arith.constant 24 : index
    %c0_7 = arith.constant 0 : index
    %9 = vector.load %arg13[%c24, %c0_7] : memref<72x256xf32, #tpu.memory_space<vmem>>, vector<6x256xf32>
    tpu.vector_store %arg13[%c24, %c0_7], %8 {strides = array<i32>} : memref<72x256xf32, #tpu.memory_space<vmem>>, vector<6x256xf32>,
    %c239_i32 = arith.constant 239 : i32
    %10 = tpu.dynamic_rotate %2 by %c239_i32 dim 1 : vector<6x256xf32>, i32 -> vector<6x256xf32>
    %c32 = arith.constant 32 : index
    %c0_8 = arith.constant 0 : index
    %11 = vector.load %arg13[%c32, %c0_8] : memref<72x256xf32, #tpu.memory_space<vmem>>, vector<6x256xf32>
    tpu.vector_store %arg13[%c32, %c0_8], %10 {strides = array<i32>} : memref<72x256xf32, #tpu.memory_space<vmem>>, vector<6x256xf32>,
    %c238_i32 = arith.constant 238 : i32
    %12 = tpu.dynamic_rotate %2 by %c238_i32 dim 1 : vector<6x256xf32>, i32 -> vector<6x256xf32>
    %c40 = arith.constant 40 : index
    %c0_9 = arith.constant 0 : index
    %13 = vector.load %arg13[%c40, %c0_9] : memref<72x256xf32, #tpu.memory_space<vmem>>, vector<6x256xf32>
    tpu.vector_store %arg13[%c40, %c0_9], %12 {strides = array<i32>} : memref<72x256xf32, #tpu.memory_space<vmem>>, vector<6x256xf32>,
    %c224_i32 = arith.constant 224 : i32
    %14 = tpu.dynamic_rotate %2 by %c224_i32 dim 1 : vector<6x256xf32>, i32 -> vector<6x256xf32>
    %c48 = arith.constant 48 : index
    %c0_10 = arith.constant 0 : index
    %15 = vector.load %arg13[%c48, %c0_10] : memref<72x256xf32, #tpu.memory_space<vmem>>, vector<6x256xf32>
    tpu.vector_store %arg13[%c48, %c0_10], %14 {strides = array<i32>} : memref<72x256xf32, #tpu.memory_space<vmem>>, vector<6x256xf32>,
    %c223_i32 = arith.constant 223 : i32
    %16 = tpu.dynamic_rotate %2 by %c223_i32 dim 1 : vector<6x256xf32>, i32 -> vector<6x256xf32>
    %c56 = arith.constant 56 : index
    %c0_11 = arith.constant 0 : index
    %17 = vector.load %arg13[%c56, %c0_11] : memref<72x256xf32, #tpu.memory_space<vmem>>, vector<6x256xf32>
    tpu.vector_store %arg13[%c56, %c0_11], %16 {strides = array<i32>} : memref<72x256xf32, #tpu.memory_space<vmem>>, vector<6x256xf32>,
    %c222_i32 = arith.constant 222 : i32
    %18 = tpu.dynamic_rotate %2 by %c222_i32 dim 1 : vector<6x256xf32>, i32 -> vector<6x256xf32>
    %c64 = arith.constant 64 : index
    %c0_12 = arith.constant 0 : index
    %19 = vector.load %arg13[%c64, %c0_12] : memref<72x256xf32, #tpu.memory_space<vmem>>, vector<6x256xf32>
    tpu.vector_store %arg13[%c64, %c0_12], %18 {strides = array<i32>} : memref<72x256xf32, #tpu.memory_space<vmem>>, vector<6x256xf32>,
    %c0_13 = arith.constant 0 : index
    %c0_14 = arith.constant 0 : index
    %20 = vector.load %arg13[%c0_13, %c0_14] : memref<72x256xf32, #tpu.memory_space<vmem>>, vector<72x256xf32>
    %21 = arith.truncf %20 : vector<72x256xf32> to vector<72x256xbf16>
    %c0_15 = arith.constant 0 : index
    %c0_16 = arith.constant 0 : index
    %22 = vector.load %arg1[%c0_15, %c0_16] : memref<8x72xbf16, #tpu.memory_space<vmem>>, vector<8x72xbf16>
    %cst_17 = arith.constant dense<0.000000e+00> : vector<8x256xf32>
    %23 = tpu.matmul %22, %21, %cst_17 {dimension_numbers = #tpu.dot_dimension_numbers<[1], [0], [0], [1], [0, 0, 1, 1], [], []>} : vector<8x72xbf16>, vector<72x256xbf16>, vector<8x256xf32> -> vector<8x256xf32>
    %c0_18 = arith.constant 0 : index
    %c0_19 = arith.constant 0 : index
    %24 = vector.load %arg2[%c0_18, %c0_19] : memref<8x1xf32, #tpu.memory_space<vmem>>, vector<8x1xf32>
    %25 = vector.broadcast %24 : vector<8x1xf32> to vector<8x256xf32>
    %26 = arith.addf %23, %25 : vector<8x256xf32>
    %cst_20 = arith.constant 0.000000e+00 : f32
    %27 = vector.broadcast %cst_20 : f32 to vector<8x256xf32>
    %28 = arith.maximumf %26, %27 : vector<8x256xf32>
    %c255_i32_21 = arith.constant 255 : i32
    %29 = tpu.dynamic_rotate %28 by %c255_i32_21 dim 1 : vector<8x256xf32>, i32 -> vector<8x256xf32>
    %30 = arith.maximumf %28, %29 : vector<8x256xf32>
    %c240_i32_22 = arith.constant 240 : i32
    %31 = tpu.dynamic_rotate %30 by %c240_i32_22 dim 1 : vector<8x256xf32>, i32 -> vector<8x256xf32>
    %32 = arith.maximumf %30, %31 : vector<8x256xf32>
    %c0_23 = arith.constant 0 : index
    %c0_24 = arith.constant 0 : index
    %33 = vector.load %arg13[%c0_23, %c0_24] : memref<72x256xf32, #tpu.memory_space<vmem>>, vector<8x256xf32>
    tpu.vector_store %arg13[%c0_23, %c0_24], %32 {strides = array<i32>} : memref<72x256xf32, #tpu.memory_space<vmem>>, vector<8x256xf32>,
    %c254_i32_25 = arith.constant 254 : i32
    %34 = tpu.dynamic_rotate %32 by %c254_i32_25 dim 1 : vector<8x256xf32>, i32 -> vector<8x256xf32>
    %c8_26 = arith.constant 8 : index
    %c0_27 = arith.constant 0 : index
    %35 = vector.load %arg13[%c8_26, %c0_27] : memref<72x256xf32, #tpu.memory_space<vmem>>, vector<8x256xf32>
    tpu.vector_store %arg13[%c8_26, %c0_27], %34 {strides = array<i32>} : memref<72x256xf32, #tpu.memory_space<vmem>>, vector<8x256xf32>,
    %c252_i32 = arith.constant 252 : i32
    %36 = tpu.dynamic_rotate %32 by %c252_i32 dim 1 : vector<8x256xf32>, i32 -> vector<8x256xf32>
    %c16_28 = arith.constant 16 : index
    %c0_29 = arith.constant 0 : index
    %37 = vector.load %arg13[%c16_28, %c0_29] : memref<72x256xf32, #tpu.memory_space<vmem>>, vector<8x256xf32>
    tpu.vector_store %arg13[%c16_28, %c0_29], %36 {strides = array<i32>} : memref<72x256xf32, #tpu.memory_space<vmem>>, vector<8x256xf32>,
    %c224_i32_30 = arith.constant 224 : i32
    %38 = tpu.dynamic_rotate %32 by %c224_i32_30 dim 1 : vector<8x256xf32>, i32 -> vector<8x256xf32>
    %c24_31 = arith.constant 24 : index
    %c0_32 = arith.constant 0 : index
    %39 = vector.load %arg13[%c24_31, %c0_32] : memref<72x256xf32, #tpu.memory_space<vmem>>, vector<8x256xf32>
    tpu.vector_store %arg13[%c24_31, %c0_32], %38 {strides = array<i32>} : memref<72x256xf32, #tpu.memory_space<vmem>>, vector<8x256xf32>,
    %c222_i32_33 = arith.constant 222 : i32
    %40 = tpu.dynamic_rotate %32 by %c222_i32_33 dim 1 : vector<8x256xf32>, i32 -> vector<8x256xf32>
    %c32_34 = arith.constant 32 : index
    %c0_35 = arith.constant 0 : index
    %41 = vector.load %arg13[%c32_34, %c0_35] : memref<72x256xf32, #tpu.memory_space<vmem>>, vector<8x256xf32>
    tpu.vector_store %arg13[%c32_34, %c0_35], %40 {strides = array<i32>} : memref<72x256xf32, #tpu.memory_space<vmem>>, vector<8x256xf32>,
    %c220_i32 = arith.constant 220 : i32
    %42 = tpu.dynamic_rotate %32 by %c220_i32 dim 1 : vector<8x256xf32>, i32 -> vector<8x256xf32>
    %c40_36 = arith.constant 40 : index
    %c0_37 = arith.constant 0 : index
    %43 = vector.load %arg13[%c40_36, %c0_37] : memref<72x256xf32, #tpu.memory_space<vmem>>, vector<8x256xf32>
    tpu.vector_store %arg13[%c40_36, %c0_37], %42 {strides = array<i32>} : memref<72x256xf32, #tpu.memory_space<vmem>>, vector<8x256xf32>,
    %c192_i32 = arith.constant 192 : i32
    %44 = tpu.dynamic_rotate %32 by %c192_i32 dim 1 : vector<8x256xf32>, i32 -> vector<8x256xf32>
    %c48_38 = arith.constant 48 : index
    %c0_39 = arith.constant 0 : index
    %45 = vector.load %arg13[%c48_38, %c0_39] : memref<72x256xf32, #tpu.memory_space<vmem>>, vector<8x256xf32>
    tpu.vector_store %arg13[%c48_38, %c0_39], %44 {strides = array<i32>} : memref<72x256xf32, #tpu.memory_space<vmem>>, vector<8x256xf32>,
    %c190_i32 = arith.constant 190 : i32
    %46 = tpu.dynamic_rotate %32 by %c190_i32 dim 1 : vector<8x256xf32>, i32 -> vector<8x256xf32>
    %c56_40 = arith.constant 56 : index
    %c0_41 = arith.constant 0 : index
    %47 = vector.load %arg13[%c56_40, %c0_41] : memref<72x256xf32, #tpu.memory_space<vmem>>, vector<8x256xf32>
    tpu.vector_store %arg13[%c56_40, %c0_41], %46 {strides = array<i32>} : memref<72x256xf32, #tpu.memory_space<vmem>>, vector<8x256xf32>,
    %c188_i32 = arith.constant 188 : i32
    %48 = tpu.dynamic_rotate %32 by %c188_i32 dim 1 : vector<8x256xf32>, i32 -> vector<8x256xf32>
    %c64_42 = arith.constant 64 : index
    %c0_43 = arith.constant 0 : index
    %49 = vector.load %arg13[%c64_42, %c0_43] : memref<72x256xf32, #tpu.memory_space<vmem>>, vector<8x256xf32>
    tpu.vector_store %arg13[%c64_42, %c0_43], %48 {strides = array<i32>} : memref<72x256xf32, #tpu.memory_space<vmem>>, vector<8x256xf32>,
    %c0_44 = arith.constant 0 : index
    %c0_45 = arith.constant 0 : index
    %50 = vector.load %arg13[%c0_44, %c0_45] : memref<72x256xf32, #tpu.memory_space<vmem>>, vector<72x256xf32>
    %51 = arith.truncf %50 : vector<72x256xf32> to vector<72x256xbf16>
    %c0_46 = arith.constant 0 : index
    %c0_47 = arith.constant 0 : index
    %52 = vector.load %arg3[%c0_46, %c0_47] : memref<16x72xbf16, #tpu.memory_space<vmem>>, vector<16x72xbf16>
    %cst_48 = arith.constant dense<0.000000e+00> : vector<16x256xf32>
    %53 = tpu.matmul %52, %51, %cst_48 {dimension_numbers = #tpu.dot_dimension_numbers<[1], [0], [0], [1], [0, 0, 1, 1], [], []>} : vector<16x72xbf16>, vector<72x256xbf16>, vector<16x256xf32> -> vector<16x256xf32>
    %c0_49 = arith.constant 0 : index
    %c0_50 = arith.constant 0 : index
    %54 = vector.load %arg4[%c0_49, %c0_50] : memref<16x1xf32, #tpu.memory_space<vmem>>, vector<16x1xf32>
    %55 = vector.broadcast %54 : vector<16x1xf32> to vector<16x256xf32>
    %56 = arith.addf %53, %55 : vector<16x256xf32>
    %cst_51 = arith.constant 0.000000e+00 : f32
    %57 = vector.broadcast %cst_51 : f32 to vector<16x256xf32>
    %58 = arith.maximumf %56, %57 : vector<16x256xf32>
    %c254_i32_52 = arith.constant 254 : i32
    %59 = tpu.dynamic_rotate %58 by %c254_i32_52 dim 1 : vector<16x256xf32>, i32 -> vector<16x256xf32>
    %60 = arith.maximumf %58, %59 : vector<16x256xf32>
    %c224_i32_53 = arith.constant 224 : i32
    %61 = tpu.dynamic_rotate %60 by %c224_i32_53 dim 1 : vector<16x256xf32>, i32 -> vector<16x256xf32>
    %62 = arith.maximumf %60, %61 : vector<16x256xf32>
    %63 = arith.truncf %62 : vector<16x256xf32> to vector<16x256xbf16>
    %c0_54 = arith.constant 0 : index
    %c0_55 = arith.constant 0 : index
    %64 = vector.load %arg5[%c0_54, %c0_55] : memref<256x256xbf16, #tpu.memory_space<vmem>>, vector<256x256xbf16>
    %cst_56 = arith.constant dense<0.000000e+00> : vector<16x256xf32>
    %65 = tpu.matmul %63, %64, %cst_56 {dimension_numbers = #tpu.dot_dimension_numbers<[1], [0], [0], [1], [0, 0, 1, 1], [], []>} : vector<16x256xbf16>, vector<256x256xbf16>, vector<16x256xf32> -> vector<16x256xf32>
    %c0_57 = arith.constant 0 : index
    %c0_58 = arith.constant 0 : index
    %66 = vector.load %arg6[%c0_57, %c0_58] : memref<16x256xf32, #tpu.memory_space<vmem>>, vector<16x256xf32>
    %67 = arith.mulf %65, %66 : vector<16x256xf32>
    %c0_59 = arith.constant 0 : index
    %c0_60 = arith.constant 0 : index
    %68 = vector.load %arg7[%c0_59, %c0_60] : memref<256x32xf32, #tpu.memory_space<vmem>>, vector<256x32xf32>
    %cst_61 = arith.constant dense<0.000000e+00> : vector<16x32xf32>
    %69 = tpu.matmul %67, %68, %cst_61 {dimension_numbers = #tpu.dot_dimension_numbers<[1], [0], [0], [1], [0, 0, 1, 1], [], []>} : vector<16x256xf32>, vector<256x32xf32>, vector<16x32xf32> -> vector<16x32xf32>
    %c0_62 = arith.constant 0 : index
    %c0_63 = arith.constant 0 : index
    %70 = vector.load %arg8[%c0_62, %c0_63] : memref<2x16xf32, #tpu.memory_space<vmem>>, vector<2x16xf32>
    %cst_64 = arith.constant dense<0.000000e+00> : vector<2x32xf32>
    %71 = tpu.matmul %70, %69, %cst_64 {dimension_numbers = #tpu.dot_dimension_numbers<[1], [0], [0], [1], [0, 0, 1, 1], [], []>} : vector<2x16xf32>, vector<16x32xf32>, vector<2x32xf32> -> vector<2x32xf32>
    %c0_65 = arith.constant 0 : index
    %c0_66 = arith.constant 0 : index
    %72 = vector.load %arg9[%c0_65, %c0_66] : memref<1x32xf32, #tpu.memory_space<vmem>>, vector<1x32xf32>
    %73 = vector.broadcast %72 : vector<1x32xf32> to vector<2x32xf32>
    %74 = arith.addf %71, %73 : vector<2x32xf32>
    %cst_67 = arith.constant 0.000000e+00 : f32
    %75 = vector.broadcast %cst_67 : f32 to vector<2x32xf32>
    %76 = arith.maximumf %74, %75 : vector<2x32xf32>
    %77 = arith.truncf %76 : vector<2x32xf32> to vector<2x32xbf16>
    %c0_68 = arith.constant 0 : index
    %c0_69 = arith.constant 0 : index
    %78 = vector.load %arg10[%c0_68, %c0_69] : memref<32x1xbf16, #tpu.memory_space<vmem>>, vector<32x1xbf16>
    %cst_70 = arith.constant dense<0.000000e+00> : vector<2x1xf32>
    %79 = tpu.matmul %77, %78, %cst_70 {dimension_numbers = #tpu.dot_dimension_numbers<[1], [0], [0], [1], [0, 0, 1, 1], [], []>} : vector<2x32xbf16>, vector<32x1xbf16>, vector<2x1xf32> -> vector<2x1xf32>
    %c0_71 = arith.constant 0 : index
    %c0_72 = arith.constant 0 : index
    %80 = vector.load %arg11[%c0_71, %c0_72] : memref<1x1xf32, #tpu.memory_space<vmem>>, vector<1x1xf32>
    %81 = vector.broadcast %80 : vector<1x1xf32> to vector<2x1xf32>
    %82 = arith.addf %79, %81 : vector<2x1xf32>
    %83 = arith.negf %82 : vector<2x1xf32>
    %84 = math.exp %83 : vector<2x1xf32>
    %cst_73 = arith.constant 1.000000e+00 : f32
    %85 = vector.broadcast %cst_73 : f32 to vector<2x1xf32>
    %86 = arith.addf %85, %84 : vector<2x1xf32>
    %87 = arith.divf %85, %86 : vector<2x1xf32>
    %c0_74 = arith.constant 0 : index
    %c0_75 = arith.constant 0 : index
    %88 = vector.load %arg12[%c0_74, %c0_75] : memref<2x1xf32, #tpu.memory_space<vmem>>, vector<2x1xf32>
    tpu.vector_store %arg12[%c0_74, %c0_75], %87 {strides = array<i32>} : memref<2x1xf32, #tpu.memory_space<vmem>>, vector<2x1xf32>,
    return
  }
}

</mosaic_0001>

<bundles_post_ra>
// kernel: forward.1
= control target key start
LH: loop header
LB: loop body
LE: loop exit
PB: predicated region body
PF: predicated region fallthrough
CT: control target
= control target key end

     0   :  { %v1162_v2 = vmov 0.0   ;;  %s1164_s25 = smov 94   ;;  %s1165_s26 = smov 95   ;;  %v1171_v3 = vmov 0   ;;  %v70_v5 = vlaneseq  ;;  %vm179_vm4 = vcmask 1043456   ;;  %s1681_s0 = inlined_call_operand.vmem [shape: f32[6,256], index: 0, kind: input, shape index: {}]   ;;  %s1682_s2 = inlined_call_operand.vmem [shape: f32[8,1], index: 2, kind: input, shape index: {}]   ;;  %s1683_s1 = inlined_call_operand.vmem [shape: bf16[8,72], index: 1, kind: input, shape index: {}]   ;;  %s1684_s3 = inlined_call_operand.vmem [shape: bf16[16,72], index: 3, kind: input, shape index: {}]   ;;  %s1685_s4 = inlined_call_operand.vmem [shape: f32[16,1], index: 4, kind: input, shape index: {}]   ;;  %s1686_s5 = inlined_call_operand.vmem [shape: bf16[256,256], index: 5, kind: input, shape index: {}]   ;;  %s1687_s7 = inlined_call_operand.vmem [shape: f32[256,32], index: 7, kind: input, shape index: {}]   ;;  %s1688_s6 = inlined_call_operand.vmem [shape: f32[16,256], index: 6, kind: input, shape index: {}]   ;;  %s1689_s8 = inlined_call_operand.vmem [shape: f32[2,16], index: 8, kind: input, shape index: {}]   ;;  %s1690_s10 = inlined_call_operand.vmem [shape: bf16[32,1], index: 10, kind: input, shape index: {}]   ;;  %s1691_s11 = inlined_call_operand.<no memory space> [shape: f32[1,1], index: 11, kind: input, shape index: {}]   ;;  %s1692_s9 = inlined_call_operand.vmem [shape: f32[1,32], index: 9, kind: input, shape index: {}]   ;;  %s1693_s12 = inlined_call_operand.vmem [shape: f32[2,1], index: 12, kind: output, shape index: {}]  }
   0x1   :  { %v62_v0 = vld [vmem:[%s1681_s0] sm:$0x3f]  ;;  %v63_v1 = vld [vmem:[%s1681_s0 + $0x8] sm:$0x3f]  ;;  %56 = vst [vmem:[#allocation2 + $0x10] sm:$0xff] %v1162_v2  ;;  %57 = vst [vmem:[#allocation2 + $0x48] sm:$0xff] %v1162_v2  ;;  %218 = vmatprep.mubr.bf16.mxu0 %v1171_v3  ;;  %1085 = vset.pattern.permute.xlu0 %v1171_v3 }
   0x2   :  { %44 = vst [vmem:[#allocation2] sm:$0xff] %v1162_v2  ;;  %45 = vst [vmem:[#allocation2 + $0x38] sm:$0xff] %v1162_v2  ;;  %s1163_s0 = smov 96   ;;  %131 = vrot.lane.b32.xlu0 %v62_v0, %s1164_s25  ;;  %s1166_s27 = smov 111   ;;  %404 = vmatprep.mubr.bf16.mxu1 %v1171_v3  ;;  %v169_v4 = vld [vmem:[%s1682_s2] sm:$0xff]  ;;  %v1280_v6 = vand.u32 127, %v70_v5 }
   0x3   :  { %46 = vst [vmem:[#allocation2 + $0x78] sm:$0xff] %v1162_v2  ;;  %47 = vst [vmem:[#allocation2 + $0x58] sm:$0xff] %v1162_v2  ;;  %113 = vrot.lane.b32.xlu1 %v62_v0, %s1163_s0  ;;  %s1167_s28 = smov 110   ;;  %s1168_s29 = smov 126   ;;  %v168_v5 = vld [vmem:[%s1683_s1] sm:$0xf] }
   0x4   :  { %48 = vst [vmem:[#allocation2 + $0x20] sm:$0xff] %v1162_v2  ;;  %49 = vst [vmem:[#allocation2 + $0x8] sm:$0xff] %v1162_v2  ;;  %s1169_s30 = smov 112   ;;  %s1170_s13 = smov 127   ;;  %1086 = vset.pattern.permute.xlu1 %v1171_v3  ;;  %vm117_vm0 = vcmp.lt.s32.totalorder %v1280_v6, 96  ;;  %vm135_vm1 = vcmp.lt.s32.totalorder %v1280_v6, 94 }
   0x5   :  { %50 = vst [vmem:[#allocation2 + $0x70] sm:$0xff] %v1162_v2  ;;  %51 = vst [vmem:[#allocation2 + $0x80] sm:$0xff] %v1162_v2  ;;  %vm126_vm2 = vcmp.lt.s32.totalorder %v1280_v6, 95  ;;  %vm99_vm3 = vcmp.lt.s32.totalorder %v1280_v6, 111  ;;  %vm108_vm5 = vcmp.lt.s32.totalorder %v1280_v6, 110  ;;  %vm81_vm6 = vcmp.lt.s32.totalorder %v1280_v6, 126 }
   0x6   :  { %52 = vst [vmem:[#allocation2 + $0x88] sm:$0xff] %v1162_v2  ;;  %53 = vst [vmem:[#allocation2 + $0x40] sm:$0xff] %v1162_v2  ;;  %133 = vrot.lane.b32.xlu0 %v63_v1, %s1164_s25  ;;  %vm90_vm7 = vcmp.lt.s32.totalorder %v1280_v6, 112  ;;  %vm72_vm8 = vcmp.lt.s32.totalorder %v1280_v6, 127  ;;  %vm175_vm9 = vcmask 588800   ;;  %s1172_s1 = smov 60  }
   0x7   :  { %54 = vst [vmem:[#allocation2 + $0x50] sm:$0xff] %v1162_v2  ;;  %55 = vst [vmem:[#allocation2 + $0x28] sm:$0xff] %v1162_v2  ;;  %115 = vrot.lane.b32.xlu1 %v63_v1, %s1163_s0  ;;  %s1173_s17 = smov 64   ;;  %s1174_s18 = smov 62   ;;  %vm311_vm10 = vcmp.lt.s32.totalorder %v1280_v6, 60  ;;  %vm293_vm11 = vcmp.lt.s32.totalorder %v1280_v6, 64 }
   0x8   :  { %58 = vst [vmem:[#allocation2 + $0x30] sm:$0xff] %v1162_v2  ;;  %59 = vst [vmem:[#allocation2 + $0x18] sm:$0xff] %v1162_v2  ;;  %s1175_s19 = smov 92   ;;  %s1176_s20 = smov 124   ;;  %vm302_vm12 = vcmp.lt.s32.totalorder %v1280_v6, 62  ;;  %vm284_vm13 = vcmp.lt.s32.totalorder %v1280_v6, 92 }
   0x9   :  { %60 = vst [vmem:[#allocation2 + $0x68] sm:$0xff] %v1162_v2  ;;  %61 = vst [vmem:[#allocation2 + $0x60] sm:$0xff] %v1162_v2  ;;  %vm259_vm14 = vcmp.lt.s32.totalorder %v1280_v6, 124  ;;  %v698_v6 = vld [vmem:[%s1687_s7 + $0x10] sm:$0xff]  ;;  %vm1177_vm15 = vmmov 0  }
   0xa   :  { %64 = vst [vmem:[#allocation2] sm:$0x3f] %v62_v0  ;;  %65 = vst [vmem:[#allocation2 + $0x38] sm:$0x3f] %v63_v1  ;;  %122 = vrot.lane.b32.xlu0 %v62_v0, %s1165_s26 }
   0xb   :  { %124 = vrot.lane.b32.xlu1 %v63_v1, %s1165_s26 }
   0xe   :  { %95 = vrot.lane.b32.xlu0 %v62_v0, %s1166_s27 }
   0xf   :  { %97 = vrot.lane.b32.xlu1 %v63_v1, %s1166_s27 }
  0x11   :  { %v141_v62 = vld [vmem:[#allocation2 + $0x38] sm:$0xff]  ;;  %v140_v63 = vld [vmem:[#allocation2] sm:$0xff] }
  0x12   :  { %104 = vrot.lane.b32.xlu0 %v62_v0, %s1167_s28 }
  0x13   :  { %106 = vrot.lane.b32.xlu1 %v63_v1, %s1167_s28 }
  0x16   :  { %77 = vrot.lane.b32.xlu0 %v62_v0, %s1168_s29 }
  0x17   :  { %79 = vrot.lane.b32.xlu1 %v63_v1, %s1168_s29 }
  0x1a   :  { %86 = vrot.lane.b32.xlu0 %v62_v0, %s1169_s30 }
  0x1b   :  { %88 = vrot.lane.b32.xlu1 %v63_v1, %s1169_s30 }
  0x1e   :  { %66 = vrot.lane.b32.xlu0 %v62_v0, %s1170_s13 }
  0x1f   :  { %68 = vrot.lane.b32.xlu1 %v63_v1, %s1170_s13 }
  0x22   :  { %172 = vperm.xlu0 %1085, %v169_v4  }
  0x74   :  { %v132_v8 = vpop.permute.xlu0 %131 }
  0x75   :  { %v114_v7 = vpop.permute.xlu1 %113 }
  0x78   :  { %v134_v10 = vpop.permute.xlu0 %133 }
  0x79   :  { %v116_v9 = vpop.permute.xlu1 %115  ;;  %v136_v13 = vsel %vm135_vm1, %v132_v8, %v134_v10  ;;  %v137_v14 = vsel %vm135_vm1, %v134_v10, %v132_v8 }
  0x7a   :  { %v118_v11 = vsel %vm117_vm0, %v114_v7, %v116_v9  ;;  %v119_v12 = vsel %vm117_vm0, %v116_v9, %v114_v7  ;;  %138 = vst [vmem:[#allocation2 + $0x68] sm:$0x3f] %v136_v13  ;;  %139 = vst [vmem:[#allocation2 + $0x60] sm:$0x3f] %v137_v14 }
  0x7b   :  { %120 = vst [vmem:[#allocation2 + $0x10] sm:$0x3f] %v118_v11  ;;  %121 = vst [vmem:[#allocation2 + $0x48] sm:$0x3f] %v119_v12 }
  0x7c   :  { %v123_v16 = vpop.permute.xlu0 %122 }
  0x7d   :  { %v125_v15 = vpop.permute.xlu1 %124 }
  0x7e   :  { %v127_v17 = vsel %vm126_vm2, %v123_v16, %v125_v15  ;;  %v128_v18 = vsel %vm126_vm2, %v125_v15, %v123_v16  ;;  %vm960_vm2 = vcmask 1024  }
  0x7f   :  { %129 = vst [vmem:[#allocation2 + $0x30] sm:$0x3f] %v127_v17  ;;  %130 = vst [vmem:[#allocation2 + $0x18] sm:$0x3f] %v128_v18 }
  0x80   :  { %v96_v20 = vpop.permute.xlu0 %95 }
  0x81   :  { %v98_v19 = vpop.permute.xlu1 %97  ;;  %v157_v23 = vld [vmem:[#allocation2 + $0x60] sm:$0xff]  ;;  %v156_v24 = vld [vmem:[#allocation2 + $0x68] sm:$0xff] }
  0x82   :  { %v100_v21 = vsel %vm99_vm3, %v96_v20, %v98_v19  ;;  %v101_v22 = vsel %vm99_vm3, %v98_v19, %v96_v20  ;;  %v167_v25 = vpack.c.bf16 %v157_v23, %v157_v23  ;;  %v166_v26 = vpack.c.bf16 %v156_v24, %v156_v24  ;;  %v153_v30 = vld [vmem:[#allocation2 + $0x48] sm:$0xff]  ;;  %v152_v34 = vld [vmem:[#allocation2 + $0x10] sm:$0xff] }
  0x83   :  { %102 = vst [vmem:[#allocation2 + $0x88] sm:$0x3f] %v100_v21  ;;  %103 = vst [vmem:[#allocation2 + $0x40] sm:$0x3f] %v101_v22 }
  0x84   :  { %966 = vmatprep.subr.msk.bf16.mxu0 %vm179_vm4, %v167_v25  ;;  %v105_v28 = vpop.permute.xlu0 %104  ;;  %v181_v29 = vsel %vm179_vm4, %v166_v26, 0 }
  0x85   :  { %v107_v27 = vpop.permute.xlu1 %106  ;;  %193 = vmatpush1.bf16.msra.mxu0 %v181_v29  ;;  %v347_v29 = vld [vmem:[%s1685_s4 + $0x8] sm:$0xff] }
  0x86   :  { %v109_v31 = vsel %vm108_vm5, %v105_v28, %v107_v27  ;;  %v110_v32 = vsel %vm108_vm5, %v107_v27, %v105_v28  ;;  %v155_v33 = vld [vmem:[#allocation2 + $0x18] sm:$0xff]  ;;  %v154_v35 = vld [vmem:[#allocation2 + $0x30] sm:$0xff]  ;;  %v346_v28 = vld [vmem:[%s1685_s4] sm:$0xff] }
  0x87   :  { %111 = vst [vmem:[#allocation2 + $0x50] sm:$0x3f] %v109_v31  ;;  %112 = vst [vmem:[#allocation2 + $0x28] sm:$0x3f] %v110_v32  ;;  %v165_v36 = vpack.c.bf16 %v155_v33, %v153_v30  ;;  %v164_v37 = vpack.c.bf16 %v154_v35, %v152_v34 }
  0x88   :  { %v78_v39 = vpop.permute.xlu0 %77 }
  0x89   :  { %v80_v38 = vpop.permute.xlu1 %79  ;;  %194 = vmatprep.subr.bf16.mxu0 %v165_v36 }
  0x8a   :  { %v82_v40 = vsel %vm81_vm6, %v78_v39, %v80_v38  ;;  %v83_v41 = vsel %vm81_vm6, %v80_v38, %v78_v39  ;;  %195 = vmatpush1.bf16.msra.mxu0 %v164_v37  ;;  %v149_v44 = vld [vmem:[#allocation2 + $0x40] sm:$0xff]  ;;  %v148_v48 = vld [vmem:[#allocation2 + $0x88] sm:$0xff] }
  0x8b   :  { %84 = vst [vmem:[#allocation2 + $0x20] sm:$0x3f] %v82_v40  ;;  %85 = vst [vmem:[#allocation2 + $0x8] sm:$0x3f] %v83_v41 }
  0x8c   :  { %v87_v43 = vpop.permute.xlu0 %86 }
  0x8d   :  { %v89_v42 = vpop.permute.xlu1 %88 }
  0x8e   :  { %v91_v45 = vsel %vm90_vm7, %v87_v43, %v89_v42  ;;  %v92_v46 = vsel %vm90_vm7, %v89_v42, %v87_v43  ;;  %v151_v47 = vld [vmem:[#allocation2 + $0x28] sm:$0xff]  ;;  %v150_v49 = vld [vmem:[#allocation2 + $0x50] sm:$0xff] }
  0x8f   :  { %93 = vst [vmem:[#allocation2 + $0x70] sm:$0x3f] %v91_v45  ;;  %94 = vst [vmem:[#allocation2 + $0x80] sm:$0x3f] %v92_v46  ;;  %v163_v50 = vpack.c.bf16 %v151_v47, %v149_v44  ;;  %v162_v51 = vpack.c.bf16 %v150_v49, %v148_v48 }
  0x90   :  { %v67_v53 = vpop.permute.xlu0 %66 }
  0x91   :  { %v69_v52 = vpop.permute.xlu1 %68  ;;  %196 = vmatprep.subr.bf16.mxu0 %v163_v50 }
  0x92   :  { %v73_v54 = vsel %vm72_vm8, %v67_v53, %v69_v52  ;;  %v74_v55 = vsel %vm72_vm8, %v69_v52, %v67_v53  ;;  %197 = vmatpush1.bf16.msra.mxu0 %v162_v51  ;;  %v145_v56 = vld [vmem:[#allocation2 + $0x8] sm:$0xff]  ;;  %v144_v58 = vld [vmem:[#allocation2 + $0x20] sm:$0xff] }
  0x93   :  { %75 = vst [vmem:[#allocation2 + $0x78] sm:$0x3f] %v73_v54  ;;  %76 = vst [vmem:[#allocation2 + $0x58] sm:$0x3f] %v74_v55 }
  0x96   :  { %v147_v57 = vld [vmem:[#allocation2 + $0x80] sm:$0xff]  ;;  %v146_v59 = vld [vmem:[#allocation2 + $0x70] sm:$0xff] }
  0x97   :  { %v161_v60 = vpack.c.bf16 %v147_v57, %v145_v56  ;;  %v160_v61 = vpack.c.bf16 %v146_v59, %v144_v58 }
  0x99   :  { %198 = vmatprep.subr.bf16.mxu0 %v161_v60 }
  0x9a   :  { %199 = vmatpush1.bf16.msra.mxu0 %v160_v61  ;;  %v143_v0 = vld [vmem:[#allocation2 + $0x58] sm:$0xff] }
  0x9b   :  { %v142_v1 = vld [vmem:[#allocation2 + $0x78] sm:$0xff]  ;;  %v159_v3 = vpack.c.bf16 %v143_v0, %v141_v62 }
  0x9c   :  { %v158_v4 = vpack.c.bf16 %v142_v1, %v140_v63 }
  0x9d   :  { %200 = vmatprep.subr.bf16.mxu0 %v159_v3  ;;  %v173_v7 = vpop.permute.xlu0 %172 }
  0x9e   :  { %201 = vmatpush1.bf16.msra.mxu0 %v158_v4 }
  0xa1   :  { %967 = vmatmul.mubr.msk.bf16.vlgmr.msra.gmra.mxu0 %vm175_vm9, %v168_v5 }
 0x161   :  { %v220_v8 = vpop.f32.mrf.mxu0 }
 0x162   :  { %v221_v9 = vadd.f32 %v220_v8, %v173_v7 }
 0x163   :  { %v222_v10 = vpop.f32.mrf.mxu0 }
 0x164   :  { %v227_v11 = vmax.f32 %v221_v9, 0.0  ;;  %v223_v12 = vadd.f32 %v222_v10, %v173_v7 }
 0x165   :  { %v224_v13 = vpop.f32.mrf.mxu0 }
 0x166   :  { %229 = vrot.lane.b32.xlu1 %v227_v11, %s1170_s13  ;;  %v228_v15 = vmax.f32 %v223_v12, 0.0 }
 0x167   :  { %v225_v14 = vpop.f32.mrf.mxu0 }
 0x16a   :  { %231 = vrot.lane.b32.xlu1 %v228_v15, %s1170_s13 }
 0x1d8   :  { %v230_v16 = vpop.permute.xlu1 %229 }
 0x1dc   :  { %v232_v17 = vpop.permute.xlu1 %231 }
 0x1dd   :  { %v233_v18 = vsel %vm72_vm8, %v230_v16, %v232_v17  ;;  %v234_v19 = vsel %vm72_vm8, %v232_v17, %v230_v16 }
 0x1de   :  { %v235_v20 = vmax.f32 %v227_v11, %v233_v18  ;;  %v236_v21 = vmax.f32 %v228_v15, %v234_v19  ;;  %v1107_v11 = vld [vmem:[%s1684_s3] sm:$0xff]  }
 0x1e0   :  { %239 = vrot.lane.b32.xlu1 %v236_v21, %s1169_s30  ;;  %237 = vrot.lane.b32.xlu0 %v235_v20, %s1169_s30 }
 0x252   :  { %v240_v22 = vpop.permute.xlu1 %239  ;;  %v238_v23 = vpop.permute.xlu0 %237 }
 0x253   :  { %v241_v24 = vsel %vm90_vm7, %v238_v23, %v240_v22  ;;  %v242_v25 = vsel %vm90_vm7, %v240_v22, %v238_v23 }
 0x254   :  { %v1328_v26 = vmax.f32 %v235_v20, %v241_v24  ;;  %v1330_v27 = vmax.f32 %v236_v21, %v242_v25  ;;  %v1108_v24 = vld [vmem:[%s1686_s5 + $0x70] ss:$8 sps:$4 sm:$0xff]  }
 0x256   :  { %245 = vst [vmem:[#allocation2] sm:$0xff] %v1328_v26  ;;  %246 = vst [vmem:[#allocation2 + $0x38] sm:$0xff] %v1330_v27  ;;  %309 = vrot.lane.b32.xlu1 %v1330_v27, %s1172_s1  ;;  %307 = vrot.lane.b32.xlu0 %v1328_v26, %s1172_s1 }
 0x25a   :  { %291 = vrot.lane.b32.xlu1 %v1330_v27, %s1173_s17  ;;  %289 = vrot.lane.b32.xlu0 %v1328_v26, %s1173_s17 }
 0x25e   :  { %300 = vrot.lane.b32.xlu1 %v1330_v27, %s1174_s18  ;;  %298 = vrot.lane.b32.xlu0 %v1328_v26, %s1174_s18 }
 0x262   :  { %274 = vrot.lane.b32.xlu1 %v1330_v27, %s1164_s25  ;;  %272 = vrot.lane.b32.xlu0 %v1328_v26, %s1164_s25 }
 0x266   :  { %282 = vrot.lane.b32.xlu1 %v1330_v27, %s1175_s19  ;;  %280 = vrot.lane.b32.xlu0 %v1328_v26, %s1175_s19 }
 0x26a   :  { %257 = vrot.lane.b32.xlu1 %v1330_v27, %s1176_s20  ;;  %255 = vrot.lane.b32.xlu0 %v1328_v26, %s1176_s20 }
 0x26e   :  { %266 = vrot.lane.b32.xlu1 %v1330_v27, %s1163_s0  ;;  %264 = vrot.lane.b32.xlu0 %v1328_v26, %s1163_s0 }
 0x272   :  { %249 = vrot.lane.b32.xlu1 %v1330_v27, %s1168_s29  ;;  %247 = vrot.lane.b32.xlu0 %v1328_v26, %s1168_s29 }
 0x276   :  { %350 = vperm.xlu0 %1085, %v346_v28   ;;  %355 = vperm.xlu1 %1086, %v347_v29   ;;  %v1110_v28 = vld [vmem:[%s1686_s5 + $0x74] ss:$8 sps:$4 sm:$0xff]   ;;  %v1113_v29 = vld [vmem:[%s1686_s5 + $0x64] ss:$8 sps:$4 sm:$0xff]  }
 0x277   :  { %645 = vmatprep.subr.bf16.mxu0 %v1110_v28  ;;  %v720_v28 = vld [vmem:[%s1687_s7 + $0xc0] sm:$0xff] }
 0x278   :  { %646 = vmatpush1.bf16.msra.mxu0 %v1108_v24  ;;  %v722_v24 = vld [vmem:[%s1687_s7 + $0xd0] sm:$0xff] }
 0x279   :  { %647 = vmatprep.subr.bf16.mxu0 %v1113_v29  ;;  %v704_v29 = vld [vmem:[%s1687_s7 + $0x40] sm:$0xff] }
 0x2c8   :  { %v310_v30 = vpop.permute.xlu1 %309  ;;  %v308_v31 = vpop.permute.xlu0 %307 }
 0x2c9   :  { %v312_v32 = vsel %vm311_vm10, %v308_v31, %v310_v30  ;;  %v313_v33 = vsel %vm311_vm10, %v310_v30, %v308_v31  ;;  %v1111_v31 = vld [vmem:[%s1686_s5 + $0x60] ss:$8 sps:$4 sm:$0xff]  }
 0x2ca   :  { %314 = vst [vmem:[#allocation2 + $0x68] sm:$0xff] %v312_v32  ;;  %315 = vst [vmem:[#allocation2 + $0x60] sm:$0xff] %v313_v33  ;;  %v343_v34 = vpack.c.bf16 %v313_v33, %v313_v33  ;;  %v342_v35 = vpack.c.bf16 %v312_v32, %v312_v32  ;;  %v1116_v32 = vld [vmem:[%s1686_s5 + $0x54] ss:$8 sps:$4 sm:$0xff]   ;;  %648 = vmatpush1.bf16.msra.mxu0 %v1111_v31  ;;  %v1114_v33 = vld [vmem:[%s1686_s5 + $0x50] ss:$8 sps:$4 sm:$0xff]  }
 0x2cb   :  { %649 = vmatprep.subr.bf16.mxu0 %v1116_v32  ;;  %v703_v31 = vld [vmem:[%s1687_s7 + $0x38] sm:$0xff]  ;;  %v718_v32 = vld [vmem:[%s1687_s7 + $0xb0] sm:$0xff] }
 0x2cc   :  { %v292_v36 = vpop.permute.xlu1 %291  ;;  %v290_v37 = vpop.permute.xlu0 %289  ;;  %969 = vmatprep.subr.msk.bf16.mxu1 %vm179_vm4, %v343_v34  ;;  %v367_v38 = vsel %vm179_vm4, %v342_v35, 0  ;;  %v1119_v34 = vld [vmem:[%s1686_s5 + $0x44] ss:$8 sps:$4 sm:$0xff]   ;;  %v1117_v35 = vld [vmem:[%s1686_s5 + $0x40] ss:$8 sps:$4 sm:$0xff]  }
 0x2cd   :  { %v294_v39 = vsel %vm293_vm11, %v290_v37, %v292_v36  ;;  %v295_v40 = vsel %vm293_vm11, %v292_v36, %v290_v37  ;;  %379 = vmatpush1.bf16.msra.mxu1 %v367_v38  ;;  %v1122_v36 = vld [vmem:[%s1686_s5 + $0x34] ss:$8 sps:$4 sm:$0xff]   ;;  %v1120_v37 = vld [vmem:[%s1686_s5 + $0x30] ss:$8 sps:$4 sm:$0xff]   ;;  %v1125_v38 = vld [vmem:[%s1686_s5 + $0x24] ss:$8 sps:$4 sm:$0xff]  }
 0x2ce   :  { %296 = vst [vmem:[#allocation2 + $0x10] sm:$0xff] %v294_v39  ;;  %297 = vst [vmem:[#allocation2 + $0x48] sm:$0xff] %v295_v40  ;;  %650 = vmatpush1.bf16.msra.mxu0 %v1114_v33  ;;  %v702_v33 = vld [vmem:[%s1687_s7 + $0x30] sm:$0xff] }
 0x2cf   :  { %651 = vmatprep.subr.bf16.mxu0 %v1119_v34  ;;  %v717_v34 = vld [vmem:[%s1687_s7 + $0xa8] sm:$0xff] }
 0x2d0   :  { %v301_v41 = vpop.permute.xlu1 %300  ;;  %v299_v42 = vpop.permute.xlu0 %298 }
 0x2d1   :  { %v303_v43 = vsel %vm302_vm12, %v299_v42, %v301_v41  ;;  %v304_v44 = vsel %vm302_vm12, %v301_v41, %v299_v42  ;;  %v1126_v41 = vld [vmem:[%s1686_s5 + $0x10] ss:$8 sps:$4 sm:$0xff]   ;;  %v1131_v42 = vld [vmem:[%s1686_s5 + $0x4] ss:$8 sps:$4 sm:$0xff]  }
 0x2d2   :  { %305 = vst [vmem:[#allocation2 + $0x30] sm:$0xff] %v303_v43  ;;  %306 = vst [vmem:[#allocation2 + $0x18] sm:$0xff] %v304_v44  ;;  %v341_v45 = vpack.c.bf16 %v304_v44, %v295_v40  ;;  %v340_v46 = vpack.c.bf16 %v303_v43, %v294_v39  ;;  %652 = vmatpush1.bf16.msra.mxu0 %v1117_v35  ;;  %v1123_v39 = vld [vmem:[%s1686_s5 + $0x20] ss:$8 sps:$4 sm:$0xff]   ;;  %v1128_v40 = vld [vmem:[%s1686_s5 + $0x14] ss:$8 sps:$4 sm:$0xff]  }
 0x2d3   :  { %653 = vmatprep.subr.bf16.mxu0 %v1122_v36  ;;  %v1129_v43 = vld [vmem:[%s1686_s5] ss:$8 sps:$4 sm:$0xff]   ;;  %v1134_v44 = vld [vmem:[%s1686_s5 + $0xf4] ss:$8 sps:$4 sm:$0xff]  }
 0x2d4   :  { %v275_v47 = vpop.permute.xlu1 %274  ;;  %v273_v48 = vpop.permute.xlu0 %272  ;;  %380 = vmatprep.subr.bf16.mxu1 %v341_v45  ;;  %v1132_v45 = vld [vmem:[%s1686_s5 + $0xf0] ss:$8 sps:$4 sm:$0xff]   ;;  %v701_v35 = vld [vmem:[%s1687_s7 + $0x28] sm:$0xff]  ;;  %v716_v36 = vld [vmem:[%s1687_s7 + $0xa0] sm:$0xff] }
 0x2d5   :  { %v276_v49 = vsel %vm135_vm1, %v273_v48, %v275_v47  ;;  %v277_v50 = vsel %vm135_vm1, %v275_v47, %v273_v48  ;;  %381 = vmatpush1.bf16.msra.mxu1 %v340_v46  ;;  %v1137_v46 = vld [vmem:[%s1686_s5 + $0xe4] ss:$8 sps:$4 sm:$0xff]   ;;  %v1135_v47 = vld [vmem:[%s1686_s5 + $0xe0] ss:$8 sps:$4 sm:$0xff]   ;;  %v1140_v48 = vld [vmem:[%s1686_s5 + $0xd4] ss:$8 sps:$4 sm:$0xff]  }
 0x2d6   :  { %278 = vst [vmem:[#allocation2 + $0x88] sm:$0xff] %v276_v49  ;;  %279 = vst [vmem:[#allocation2 + $0x40] sm:$0xff] %v277_v50  ;;  %654 = vmatpush1.bf16.msra.mxu0 %v1120_v37  ;;  %v700_v37 = vld [vmem:[%s1687_s7 + $0x20] sm:$0xff]  ;;  %vm910_vm1 = vcmask 261120  }
 0x2d7   :  { %655 = vmatprep.subr.bf16.mxu0 %v1125_v38  ;;  %v715_v38 = vld [vmem:[%s1687_s7 + $0x98] sm:$0xff] }
 0x2d8   :  { %v283_v51 = vpop.permute.xlu1 %282  ;;  %v281_v52 = vpop.permute.xlu0 %280 }
 0x2d9   :  { %v285_v53 = vsel %vm284_vm13, %v281_v52, %v283_v51  ;;  %v286_v54 = vsel %vm284_vm13, %v283_v51, %v281_v52  ;;  %v1141_v51 = vld [vmem:[%s1686_s5 + $0xc0] ss:$8 sps:$4 sm:$0xff]   ;;  %v1146_v52 = vld [vmem:[%s1686_s5 + $0xb4] ss:$8 sps:$4 sm:$0xff]  }
 0x2da   :  { %287 = vst [vmem:[#allocation2 + $0x50] sm:$0xff] %v285_v53  ;;  %288 = vst [vmem:[#allocation2 + $0x28] sm:$0xff] %v286_v54  ;;  %v339_v55 = vpack.c.bf16 %v286_v54, %v277_v50  ;;  %v338_v56 = vpack.c.bf16 %v285_v53, %v276_v49  ;;  %656 = vmatpush1.bf16.msra.mxu0 %v1123_v39  ;;  %v1138_v49 = vld [vmem:[%s1686_s5 + $0xd0] ss:$8 sps:$4 sm:$0xff]   ;;  %v1143_v50 = vld [vmem:[%s1686_s5 + $0xc4] ss:$8 sps:$4 sm:$0xff]  }
 0x2db   :  { %657 = vmatprep.subr.bf16.mxu0 %v1128_v40  ;;  %v1144_v53 = vld [vmem:[%s1686_s5 + $0xb0] ss:$8 sps:$4 sm:$0xff]   ;;  %v1149_v54 = vld [vmem:[%s1686_s5 + $0xa4] ss:$8 sps:$4 sm:$0xff]  }
 0x2dc   :  { %v258_v57 = vpop.permute.xlu1 %257  ;;  %v256_v58 = vpop.permute.xlu0 %255  ;;  %382 = vmatprep.subr.bf16.mxu1 %v339_v55  ;;  %v1147_v55 = vld [vmem:[%s1686_s5 + $0xa0] ss:$8 sps:$4 sm:$0xff]   ;;  %v699_v39 = vld [vmem:[%s1687_s7 + $0x18] sm:$0xff] }
 0x2dd   :  { %v260_v59 = vsel %vm259_vm14, %v256_v58, %v258_v57  ;;  %v261_v60 = vsel %vm259_vm14, %v258_v57, %v256_v58  ;;  %383 = vmatpush1.bf16.msra.mxu1 %v338_v56  ;;  %v1152_v56 = vld [vmem:[%s1686_s5 + $0x94] ss:$8 sps:$4 sm:$0xff]   ;;  %v1150_v57 = vld [vmem:[%s1686_s5 + $0x90] ss:$8 sps:$4 sm:$0xff]  }
 0x2de   :  { %262 = vst [vmem:[#allocation2 + $0x20] sm:$0xff] %v260_v59  ;;  %263 = vst [vmem:[#allocation2 + $0x8] sm:$0xff] %v261_v60  ;;  %658 = vmatpush1.bf16.msra.mxu0 %v1126_v41 }
 0x2df   :  { %659 = vmatprep.subr.bf16.mxu0 %v1131_v42 }
 0x2e0   :  { %v267_v61 = vpop.permute.xlu1 %266  ;;  %v265_v62 = vpop.permute.xlu0 %264 }
 0x2e1   :  { %v268_v63 = vsel %vm117_vm0, %v265_v62, %v267_v61  ;;  %v269_v0 = vsel %vm117_vm0, %v267_v61, %v265_v62 }
 0x2e2   :  { %270 = vst [vmem:[#allocation2 + $0x70] sm:$0xff] %v268_v63  ;;  %271 = vst [vmem:[#allocation2 + $0x80] sm:$0xff] %v269_v0  ;;  %v337_v1 = vpack.c.bf16 %v269_v0, %v261_v60  ;;  %v336_v3 = vpack.c.bf16 %v268_v63, %v260_v59  ;;  %660 = vmatpush1.bf16.msra.mxu0 %v1129_v43  ;;  %v1153_v59 = vld [vmem:[%s1686_s5 + $0x80] ss:$8 sps:$4 sm:$0xff]   ;;  %v1155_v60 = vld [vmem:[%s1686_s5 + $0x84] ss:$8 sps:$4 sm:$0xff]  }
 0x2e3   :  { %661 = vmatprep.subr.bf16.mxu0 %v1134_v44 }
 0x2e4   :  { %v250_v4 = vpop.permute.xlu1 %249  ;;  %v248_v5 = vpop.permute.xlu0 %247  ;;  %384 = vmatprep.subr.bf16.mxu1 %v337_v1 }
 0x2e5   :  { %v251_v7 = vsel %vm81_vm6, %v248_v5, %v250_v4  ;;  %v252_v8 = vsel %vm81_vm6, %v250_v4, %v248_v5  ;;  %385 = vmatpush1.bf16.msra.mxu1 %v336_v3 }
 0x2e6   :  { %253 = vst [vmem:[#allocation2 + $0x78] sm:$0xff] %v251_v7  ;;  %254 = vst [vmem:[#allocation2 + $0x58] sm:$0xff] %v252_v8  ;;  %v335_v9 = vpack.c.bf16 %v252_v8, %v1330_v27  ;;  %v334_v10 = vpack.c.bf16 %v251_v7, %v1328_v26  ;;  %662 = vmatpush2.bf16.msra.mxu0 %v1132_v45 }
 0x2e7   :  { %663 = vmatprep.subr.bf16.mxu0 %v1137_v46 }
 0x2e8   :  { %386 = vmatprep.subr.bf16.mxu1 %v335_v9 }
 0x2e9   :  { %387 = vmatpush1.bf16.msra.mxu1 %v334_v10 }
 0x2ea   :  { %664 = vmatpush2.bf16.msra.mxu0 %v1135_v47 }
 0x2eb   :  { %665 = vmatprep.subr.bf16.mxu0 %v1140_v48 }
 0x2ec   :  { %970 = vmatmul.mubr.msk.bf16.vlgmr.msra.gmra.mxu1 %vm175_vm9, %v1107_v11 }
 0x2ee   :  { %666 = vmatpush2.bf16.msra.mxu0 %v1138_v49 }
 0x2ef   :  { %667 = vmatprep.subr.bf16.mxu0 %v1143_v50 }
 0x2f1   :  { %v351_v13 = vpop.permute.xlu0 %350  ;;  %v356_v15 = vpop.permute.xlu1 %355 }
 0x2f2   :  { %668 = vmatpush2.bf16.msra.mxu0 %v1141_v51 }
 0x2f3   :  { %669 = vmatprep.subr.bf16.mxu0 %v1146_v52 }
 0x2f6   :  { %670 = vmatpush2.bf16.msra.mxu0 %v1144_v53 }
 0x2f7   :  { %671 = vmatprep.subr.bf16.mxu0 %v1149_v54 }
 0x2fa   :  { %672 = vmatpush2.bf16.msra.mxu0 %v1147_v55 }
 0x2fb   :  { %673 = vmatprep.subr.bf16.mxu0 %v1152_v56  ;;  %v714_v56 = vld [vmem:[%s1687_s7 + $0x90] sm:$0xff] }
 0x2fe   :  { %674 = vmatpush2.bf16.msra.mxu0 %v1150_v57  ;;  %v713_v57 = vld [vmem:[%s1687_s7 + $0x88] sm:$0xff] }
 0x2ff   :  { %675 = vmatprep.subr.bf16.mxu0 %v1155_v60  ;;  %v696_v60 = vld [vmem:[%s1687_s7] sm:$0xff] }
 0x302   :  { %676 = vmatpush2.bf16.msra.mxu0 %v1153_v59  ;;  %v712_v59 = vld [vmem:[%s1687_s7 + $0x80] sm:$0xff] }
 0x3ac   :  { %v406_v12 = vpop.f32.mrf.mxu1 }
 0x3ad   :  { %v1387_v16 = vadd.f32 %v406_v12, %v351_v13  ;;  %v727_v12 = vld [vmem:[%s1687_s7 + $0xf8] sm:$0xff] }
 0x3ae   :  { %v408_v14 = vpop.f32.mrf.mxu1  ;;  %1010 = vmatprep.subr.mxu1 %v727_v12 }
 0x3af   :  { %v1389_v18 = vadd.f32 %v408_v14, %v351_v13  ;;  %v415_v21 = vmax.f32 %v1387_v16, 0.0  ;;  %v711_v13 = vld [vmem:[%s1687_s7 + $0x78] sm:$0xff]  ;;  %v726_v14 = vld [vmem:[%s1687_s7 + $0xf0] sm:$0xff] }
 0x3b0   :  { %v410_v17 = vpop.f32.mrf.mxu1  ;;  %1011 = vmatpush3.msra.mxu1 %v711_v13 }
 0x3b1   :  { %v1391_v19 = vadd.f32 %v410_v17, %v356_v15  ;;  %v416_v25 = vmax.f32 %v1389_v18, 0.0  ;;  %v710_v17 = vld [vmem:[%s1687_s7 + $0x70] sm:$0xff]  ;;  %1012 = vmatprep.subr.mxu1 %v726_v14  ;;  %v725_v18 = vld [vmem:[%s1687_s7 + $0xe8] sm:$0xff] }
 0x3b2   :  { %v412_v20 = vpop.f32.mrf.mxu1  ;;  %1013 = vmatpush3.msra.mxu1 %v710_v17  ;;  %v803_v17 = vld [vmem:[%s1689_s8] sm:$0x3] }
 0x3b3   :  { %v417_v22 = vmax.f32 %v1391_v19, 0.0  ;;  %v1395_v23 = vadd.f32 %v412_v20, %v356_v15  ;;  %v709_v19 = vld [vmem:[%s1687_s7 + $0x68] sm:$0xff]  ;;  %v724_v20 = vld [vmem:[%s1687_s7 + $0xe0] sm:$0xff]  ;;  %1014 = vmatprep.subr.mxu1 %v725_v18 }
 0x3b4   :  { %1015 = vmatpush3.msra.mxu1 %v709_v19  ;;  %v1156_v18 = vld [vmem:[%s1690_s10 + $0x8] sm:$0xff]   ;;  %v1157_v19 = vld [vmem:[%s1690_s10] sm:$0xff]  }
 0x3b5   :  { %v1087_v26 = vpack.i.bf16 %v417_v22, %v415_v21  ;;  %v418_v27 = vmax.f32 %v1395_v23, 0.0  ;;  %1016 = vmatprep.subr.mxu1 %v724_v20  ;;  %v707_v23 = vld [vmem:[%s1687_s7 + $0x58] sm:$0xff]  ;;  %v17_v20 = vstv %s1691_s11 }
 0x3b6   :  { %18 = vst [vmem:[#allocation3] sm:$0x1] %v17_v20 }
 0x3b7   :  { %v1092_v30 = vpack.i.bf16 %v418_v27, %v416_v25  ;;  %1088 = vrot.lane.b32.xlu0 %v1087_v26, %s1168_s29  ;;  %v721_v26 = vld [vmem:[%s1687_s7 + $0xc8] sm:$0xff] }
 0x3b9   :  { %1093 = vrot.lane.b32.xlu1 %v1092_v30, %s1168_s29  ;;  %v719_v30 = vld [vmem:[%s1687_s7 + $0xb8] sm:$0xff] }
 0x429   :  { %v1089_v58 = vpop.permute.xlu0 %1088 }
 0x42a   :  { %v1091_v62 = vunpack.i.h.bf16 %v1089_v58  ;;  %v1090_v63 = vunpack.i.l.bf16 %v1089_v58  ;;  %v697_v58 = vld [vmem:[%s1687_s7 + $0x8] sm:$0xff] }
 0x42b   :  { %v1094_v61 = vpop.permute.xlu1 %1093 }
 0x42c   :  { %v1096_v0 = vunpack.i.h.bf16 %v1094_v61  ;;  %v1095_v1 = vunpack.i.l.bf16 %v1094_v61 }
 0x42e   :  { %v427_v3 = vsel %vm81_vm6, %v1090_v63, %v1095_v1  ;;  %v428_v4 = vsel %vm81_vm6, %v1091_v62, %v1096_v0  ;;  %v429_v5 = vsel %vm81_vm6, %v1095_v1, %v1090_v63  ;;  %v430_v7 = vsel %vm81_vm6, %v1096_v0, %v1091_v62  ;;  %v689_v62 = vld [vmem:[%s1688_s6 + $0x8] sm:$0xff]  ;;  %v688_v63 = vld [vmem:[%s1688_s6] sm:$0xff] }
 0x42f   :  { %v1515_v8 = vmax.f32 %v416_v25, %v429_v5  ;;  %v1519_v9 = vmax.f32 %v418_v27, %v430_v7  ;;  %v1523_v10 = vmax.f32 %v415_v21, %v427_v3  ;;  %v1527_v11 = vmax.f32 %v417_v22, %v428_v4  ;;  %v708_v21 = vld [vmem:[%s1687_s7 + $0x60] sm:$0xff]  ;;  %v723_v22 = vld [vmem:[%s1687_s7 + $0xd8] sm:$0xff]  ;;  %v706_v25 = vld [vmem:[%s1687_s7 + $0x50] sm:$0xff] }
 0x430   :  { %1017 = vmatpush3.msra.mxu1 %v708_v21  ;;  %v705_v27 = vld [vmem:[%s1687_s7 + $0x48] sm:$0xff]  ;;  %v691_v5 = vld [vmem:[%s1688_s6 + $0x18] sm:$0xff]  ;;  %v690_v7 = vld [vmem:[%s1688_s6 + $0x10] sm:$0xff] }
 0x431   :  { %v1102_v15 = vpack.i.bf16 %v1519_v9, %v1515_v8  ;;  %v1097_v16 = vpack.i.bf16 %v1527_v11, %v1523_v10  ;;  %1018 = vmatprep.subr.mxu1 %v723_v22  ;;  %v1003_v21 = vld [vmem:[%s1692_s9] ss:$0 sm:$0xff] }
 0x432   :  { %1019 = vmatpush3.msra.mxu1 %v707_v23 }
 0x433   :  { %1103 = vrot.lane.b32.xlu1 %v1102_v15, %s1163_s0  ;;  %1098 = vrot.lane.b32.xlu0 %v1097_v16, %s1163_s0 }
 0x434   :  { %1020 = vmatprep.subr.mxu1 %v722_v24 }
 0x435   :  { %1021 = vmatpush3.msra.mxu1 %v706_v25 }
 0x436   :  { %1022 = vmatprep.subr.mxu1 %v721_v26  ;;  %v1005_v26 = vld [vmem:[#allocation3] ss:$0 sm:$0xff] }
 0x437   :  { %1023 = vmatpush3.msra.mxu1 %v705_v27 }
 0x438   :  { %1024 = vmatprep.subr.mxu1 %v720_v28 }
 0x439   :  { %1025 = vmatpush3.msra.mxu1 %v704_v29 }
 0x43a   :  { %1026 = vmatprep.subr.mxu1 %v719_v30 }
 0x43b   :  { %1027 = vmatpush3.msra.mxu1 %v703_v31 }
 0x43c   :  { %1028 = vmatprep.subr.mxu1 %v718_v32 }
 0x43d   :  { %1029 = vmatpush3.msra.mxu1 %v702_v33 }
 0x43e   :  { %1030 = vmatprep.subr.mxu1 %v717_v34 }
 0x43f   :  { %1031 = vmatpush3.msra.mxu1 %v701_v35 }
 0x440   :  { %1032 = vmatprep.subr.mxu1 %v716_v36 }
 0x441   :  { %1033 = vmatpush3.msra.mxu1 %v700_v37 }
 0x442   :  { %1034 = vmatprep.subr.mxu1 %v715_v38 }
 0x443   :  { %1035 = vmatpush3.msra.mxu1 %v699_v39 }
 0x444   :  { %1036 = vmatprep.subr.mxu1 %v714_v56 }
 0x445   :  { %1037 = vmatpush3.msra.mxu1 %v698_v6 }
 0x446   :  { %1038 = vmatprep.subr.mxu1 %v713_v57 }
 0x447   :  { %1039 = vmatpush3.msra.mxu1 %v697_v58 }
 0x448   :  { %1040 = vmatprep.subr.mxu1 %v712_v59 }
 0x449   :  { %1041 = vmatpush3.msra.mxu1 %v696_v60 }
 0x44a   :  { %1054 = vmatprep.subr.mxu1 %v1162_v2 }
 0x4a5   :  { %v1104_v40 = vpop.permute.xlu1 %1103  ;;  %v1099_v41 = vpop.permute.xlu0 %1098 }
 0x4a6   :  { %v1106_v42 = vunpack.i.h.bf16 %v1104_v40  ;;  %v1105_v43 = vunpack.i.l.bf16 %v1104_v40  ;;  %v1101_v44 = vunpack.i.h.bf16 %v1099_v41  ;;  %v1100_v45 = vunpack.i.l.bf16 %v1099_v41 }
 0x4a8   :  { %v444_v46 = vsel %vm117_vm0, %v1101_v44, %v1106_v42  ;;  %v446_v47 = vsel %vm117_vm0, %v1106_v42, %v1101_v44  ;;  %v443_v48 = vsel %vm117_vm0, %v1100_v45, %v1105_v43  ;;  %v445_v49 = vsel %vm117_vm0, %v1105_v43, %v1100_v45 }
 0x4a9   :  { %v449_v50 = vmax.f32 %v1527_v11, %v444_v46  ;;  %v447_v51 = vmax.f32 %v1523_v10, %v443_v48  ;;  %v448_v52 = vmax.f32 %v1515_v8, %v445_v49  ;;  %v450_v53 = vmax.f32 %v1519_v9, %v446_v47 }
 0x4aa   :  { %vm811_vm0 = vcmask 130048  }
 0x4ab   :  { %v452_v54 = vpack.c.bf16 %v450_v53, %v448_v52  ;;  %v451_v55 = vpack.c.bf16 %v449_v50, %v447_v51 }
 0x4ad   :  { %677 = vmatprep.mubr.bf16.mxu0 %v452_v54 }
 0x4ae   :  { %678 = vmatmul.mubr.bf16.vlgmr.msra.gmra.mxu0 %v451_v55 }
 0x56e   :  { %v679_v61 = vpop.f32.mrf.mxu0 }
 0x56f   :  { %v692_v3 = vmul.f32 %v688_v63, %v679_v61 }
 0x570   :  { %v681_v0 = vpop.f32.mrf.mxu0 }
 0x571   :  { %v693_v1 = vmul.f32 %v689_v62, %v681_v0 }
 0x572   :  { %v683_v4 = vpop.f32.mrf.mxu0 }
 0x573   :  { %792 = vmatprep.mubr.f32.mxu1 %v693_v1  ;;  %v694_v10 = vmul.f32 %v690_v7, %v683_v4 }
 0x574   :  { %v685_v8 = vpop.f32.mrf.mxu0  ;;  %793 = vmatmul.mubr.f32.vlgmr.msra.gmra.mxu1 %v692_v3 }
 0x575   :  { %v695_v9 = vmul.f32 %v691_v5, %v685_v8 }
 0x577   :  { %797 = vmatprep.mubr.f32.mxu1 %v695_v9 }
 0x578   :  { %798 = vmatmul.mubr.f32.gmra.mxu1 %v694_v10 }
 0x579   :  { %1058 = vmatprep.mubr.msk.f32.mxu1 %vm1177_vm15, %v1162_v2 }
 0x634   :  { %v1042_v11 = vpop.f32.mrf.mxu1 }
 0x636   :  { %v1043_v12 = vpop.f32.mrf.mxu1 }
 0x637   :  { %v1044_v16 = vadd.f32 %v1043_v12, %v1042_v11 }
 0x638   :  { %v1045_v13 = vpop.f32.mrf.mxu1 }
 0x63a   :  { %v1046_v14 = vpop.f32.mrf.mxu1 }
 0x63b   :  { %v1047_v15 = vadd.f32 %v1046_v14, %v1045_v13 }
 0x63d   :  { %1055 = vmatpush3.msra.mxu1 %v1047_v15 }
 0x63e   :  { %1056 = vmatprep.subr.mxu1 %v1162_v2 }
 0x63f   :  { %1057 = vmatpush3.msra.mxu1 %v1044_v16 }
 0x640   :  { %1059 = vmatmul.mubr.msk.f32.vlgmr.msra.gmra.mxu1 %vm811_vm0, %v803_v17  ;;  %1061 = vmatprep.subr.bf16.mxu1 %v1162_v2 }
 0x641   :  { %1065 = vmatprep.mubr.msk.bf16.mxu1 %vm1177_vm15, %v1162_v2  ;;  %1062 = vmatpush3.bf16.msra.mxu1 %v1156_v18 }
 0x642   :  { %1063 = vmatprep.subr.bf16.mxu1 %v1162_v2 }
 0x645   :  { %1064 = vmatpush3.bf16.msra.mxu1 %v1157_v19 }
 0x700   :  { %v881_v22 = vpop.f32.mrf.mxu1 }
 0x701   :  { %v882_v23 = vadd.f32 %v1003_v21, %v881_v22 }
 0x702   :  { %v1060_v24 = vpop.f32.mrf.mxu1 }
 0x703   :  { %v885_v25 = vmax.f32 %v882_v23, 0.0 }
 0x705   :  { %v886_v2 = vpack.c.bf16 %v885_v25, %v885_v25 }
 0x707   :  { %1066 = vmatmul.mubr.msk.bf16.vlgmr.msra.gmra.mxu1 %vm910_vm1, %v886_v2 }
 0x7c7   :  { %v948_v27 = vpop.f32.mrf.mxu1 }
 0x7c8   :  { %v949_v28 = vadd.f32 %v1005_v26, %v948_v27 }
 0x7c9   :  { %v1067_v29 = vpop.f32.mrf.mxu1 }
 0x7ca   :  { %v1009_v30 = vmul.f32 -1.442695, %v949_v28 }
 0x7cb   :  { %v951_v31 = vpop.f32.mrf.mxu1 }
 0x7cc   :  { %1158 = vpow2.f32 %v1009_v30 }
 0x7cd   :  { %v1068_v32 = vpop.f32.mrf.mxu1 }
 0x7d9   :  { %v1159_v33 = vpop.eup %1158 }
 0x7da   :  { %v957_v34 = vadd.f32 1.0, %v1159_v33 }
 0x7dc   :  { %1160 = vrcp.f32 %v957_v34 }
 0x7e9   :  { %v1161_v35 = vpop.eup %1160 }
 0x7ea   :  { %961 = vst.msk [vmem:[%s1693_s12] sm:$0x3] %vm960_vm2, %v1161_v35 }

</bundles_post_ra>
